<compile_context>
chip_gen: v7x
topology: tpu7x:2x2x1
jax: 0.10.0
libtpu: 0.0.40
codegen_flags: <defaults>
</compile_context>

<pallas_src>
import jax
import jax.numpy as jnp
from jax import lax
from jax.experimental import pallas as pl
from jax.experimental.pallas import tpu as pltpu

LANES = 128
SUBLANES = 8
BLOCK_ELEMS = SUBLANES * LANES     # 1024
MAX_TILE_ROWS = 2048               # (2048,128) f32 block = 1 MiB
NUM_SPLITS = 2                     # leading "parallel" axis (2-TC split on v7x)


def _make_silog_kernel(tile_rows, bpc, rows_valid, need_row_mask,
                       single_step, mask_is_bool):
    kr = tile_rows // SUBLANES     # tile_rows is always a multiple of 8

    def kernel(est_ref, gt_ref, mask_ref, out_ref):
        c = pl.program_id(0)
        k = pl.program_id(1)

        m = mask_ref[...]
        pred = m if mask_is_bool else (m != 0)

        if need_row_mask:
            # Exclude rows past the array (partial last block reads
            # unspecified data) and whole overflow blocks of an uneven
            # core split (their index_map is clamped, so the *unclamped*
            # global row id here is >= rows_valid -> fully masked).
            g = c * bpc + k
            row_ids = g * tile_rows + lax.broadcasted_iota(
                jnp.int32, (tile_rows, LANES), 0)
            pred = pred & (row_ids < rows_valid)

        # Logs of the raw refs; the single select zeroes out any NaN/Inf
        # coming from masked-out / padded / garbage elements.
        d = jnp.where(pred,
                      jnp.log(est_ref[...]) - jnp.log(gt_ref[...]),
                      jnp.float32(0.0))

        # Fold the tile to one (8,128) vreg per plane with pure VPU adds.
        part_d = d.reshape(kr, SUBLANES, LANES).sum(axis=0)
        part_d2 = (d * d).reshape(kr, SUBLANES, LANES).sum(axis=0)
        part_n = pred.astype(jnp.float32).reshape(kr, SUBLANES, LANES).sum(axis=0)

        if single_step:
            out_ref[0, 0] = part_d
            out_ref[0, 1] = part_d2
            out_ref[0, 2] = part_n
        else:
            @pl.when(k == 0)
            def _():
                out_ref[0, 0] = part_d
                out_ref[0, 1] = part_d2
                out_ref[0, 2] = part_n

            @pl.when(k > 0)
            def _():
                out_ref[0, 0] += part_d
                out_ref[0, 1] += part_d2
                out_ref[0, 2] += part_n

    return kernel


def silog_loss_pallas(depth_est, depth_gt, mask, variance_focus: float):
    """SILog loss matching PyTorch silog_loss.forward semantics.

    depth_est, depth_gt: float arrays (any shape, e.g. NCHW)
    mask: boolean (or 0/1-valued) array, same shape (binarized via != 0)
    """
    est = jnp.asarray(depth_est, jnp.float32).reshape(-1)
    gt = jnp.asarray(depth_gt, jnp.float32).reshape(-1)
    m = jnp.asarray(mask).reshape(-1)        # native dtype, no conversion pass

    n = est.shape[0]
    rem = n % BLOCK_ELEMS
    if rem:
        # Rare path (flat size not a multiple of 1024): one materialized copy.
        # Typical depth-map shapes are already aligned so this never runs.
        pad = BLOCK_ELEMS - rem
        est = jnp.pad(est, (0, pad), constant_values=1.0)
        gt = jnp.pad(gt, (0, pad), constant_values=1.0)
        m = jnp.pad(m, (0, pad))             # zeros / False -> excluded

    rows = est.shape[0] // LANES             # always a multiple of 8
    tile_rows = rows if rows <= MAX_TILE_ROWS else MAX_TILE_ROWS
    total_blocks = pl.cdiv(rows, tile_rows)

    num_splits = NUM_SPLITS if total_blocks >= NUM_SPLITS else 1
    bpc = pl.cdiv(total_blocks, num_splits)          # blocks per core
    overflow = (bpc * num_splits) != total_blocks    # uneven split
    need_row_mask = overflow or (rows % tile_rows != 0)
    single_step = (bpc == 1)

    est2 = est.reshape(rows, LANES)          # free bitcast reshapes
    gt2 = gt.reshape(rows, LANES)
    m2 = m.reshape(rows, LANES)
    mask_is_bool = (m2.dtype == jnp.bool_)

    def in_index(c, k):
        g = c * bpc + k
        if overflow:
            # Clamp overflow slots onto the last real block (already resident,
            # so no extra DMA); their contribution is masked out in-kernel.
            g = jnp.minimum(g, total_blocks - 1)
        return (g, 0)

    in_spec = pl.BlockSpec((tile_rows, LANES), in_index)

    n_elems = rows * LANES
    cost = pl.CostEstimate(
        flops=9 * n_elems,
        transcendentals=2 * n_elems,
        bytes_accessed=(8 + m2.dtype.itemsize) * n_elems,
    )

    partials = pl.pallas_call(
        _make_silog_kernel(tile_rows, bpc, rows, need_row_mask,
                           single_step, mask_is_bool),
        out_shape=jax.ShapeDtypeStruct((num_splits, 3, SUBLANES, LANES),
                                       jnp.float32),
        grid_spec=pltpu.PrefetchScalarGridSpec(
            num_scalar_prefetch=0,
            grid=(num_splits, bpc),
            in_specs=[in_spec, in_spec, in_spec],
            out_specs=pl.BlockSpec((1, 3, SUBLANES, LANES),
                                   lambda c, k: (c, 0, 0, 0)),
        ),
        compiler_params=pltpu.CompilerParams(
            dimension_semantics=("parallel", "arbitrary"),
        ),
        cost_estimate=cost,
    )(est2, gt2, m2)

    # Finalize in JAX: combine per-core partials, then the scalar epilogue.
    sums = jnp.sum(partials, axis=(0, 2, 3))          # (3,)
    sum_d, sum_d2, cnt = sums[0], sums[1], sums[2]
    mean_d = sum_d / cnt
    squared_diff = sum_d2 / cnt
    vf = jnp.float32(variance_focus)
    return jnp.sqrt(jnp.maximum(squared_diff - vf * mean_d * mean_d,
                                jnp.float32(1e-6))) * jnp.float32(10.0)


def silog_loss_ref(depth_est, depth_gt, mask, variance_focus):
    m = mask.astype(jnp.float32)
    n = jnp.sum(m)
    d = (jnp.log(jnp.where(mask, depth_est, 1.0))
         - jnp.log(jnp.where(mask, depth_gt, 1.0))) * m
    squared_diff = jnp.sum(d * d) / n
    mean_diff = (jnp.sum(d) / n) ** 2
    return jnp.sqrt(jnp.maximum(squared_diff - variance_focus * mean_diff, 1e-6)) * 10.0


if __name__ == "__main__":
    key = jax.random.PRNGKey(0)
    k1, k2, k3 = jax.random.split(key, 3)

    B, C, H, W = 2, 4, 16, 16  # NCHW, matching the PyTorch convention
    variance_focus = 0.85

    depth_est = jax.random.uniform(k1, (B, C, H, W), jnp.float32, 0.5, 5.0)
    depth_gt = jax.random.uniform(k2, (B, C, H, W), jnp.float32, 0.5, 5.0)
    mask = jax.random.uniform(k3, (B, C, H, W), jnp.float32) < 0.7   # bool mask

    loss = silog_loss_pallas(depth_est, depth_gt, mask, variance_focus)
    jax.block_until_ready(loss)

    ref = silog_loss_ref(depth_est, depth_gt, mask, variance_focus)
    assert jnp.allclose(loss, ref, rtol=1e-4, atol=1e-5), (loss, ref)

    print("KERNEL_OK")
</pallas_src>

<mosaic_0001>
module attributes {stable_mosaic.version = 11 : i64} {
  func.func @kernel(%arg0: i32, %arg1: i32, %arg2: memref<16x128xf32, #tpu.memory_space<vmem>>, %arg3: memref<16x128xf32, #tpu.memory_space<vmem>>, %arg4: memref<16x128xi32, #tpu.memory_space<vmem>>, %arg5: memref<1x3x8x128xf32, #tpu.memory_space<vmem>>) attributes {dimension_semantics = [#tpu.dimension_semantics<parallel>, #tpu.dimension_semantics<arbitrary>], iteration_bounds = array<i64: 1, 1>, scalar_prefetch = 0 : i64, scratch_operands = 0 : i64, tpu.core_type = #tpu.core_type<tc>, window_params = [{transform_indices = @transform_0, window_bounds = array<i64: 16, 128>}, {transform_indices = @transform_1, window_bounds = array<i64: 16, 128>}, {transform_indices = @transform_2, window_bounds = array<i64: 16, 128>}, {transform_indices = @transform_3, window_bounds = array<i64: 1, 3, 8, 128>}]} {
    %c0 = arith.constant 0 : index
    %c0_0 = arith.constant 0 : index
    %0 = vector.load %arg4[%c0, %c0_0] : memref<16x128xi32, #tpu.memory_space<vmem>>, vector<16x128xi32>
    %cst = arith.constant dense<0> : vector<16x128xi32>
    %1 = arith.cmpi ne, %0, %cst : vector<16x128xi32>
    %c0_1 = arith.constant 0 : index
    %c0_2 = arith.constant 0 : index
    %2 = vector.load %arg2[%c0_1, %c0_2] : memref<16x128xf32, #tpu.memory_space<vmem>>, vector<16x128xf32>
    %3 = math.log %2 : vector<16x128xf32>
    %c0_3 = arith.constant 0 : index
    %c0_4 = arith.constant 0 : index
    %4 = vector.load %arg3[%c0_3, %c0_4] : memref<16x128xf32, #tpu.memory_space<vmem>>, vector<16x128xf32>
    %5 = math.log %4 : vector<16x128xf32>
    %6 = arith.subf %3, %5 : vector<16x128xf32>
    %cst_5 = arith.constant 0.000000e+00 : f32
    %7 = vector.broadcast %cst_5 : f32 to vector<16x128xf32>
    %8 = arith.select %1, %6, %7 : vector<16x128xi1>, vector<16x128xf32>
    %9 = vector.shape_cast %8 : vector<16x128xf32> to vector<2x8x128xf32>
    %cst_6 = arith.constant dense<0.000000e+00> : vector<8x128xf32>
    %10 = vector.multi_reduction <add>, %9, %cst_6 [0] : vector<2x8x128xf32> to vector<8x128xf32>
    %11 = arith.mulf %8, %8 : vector<16x128xf32>
    %12 = vector.shape_cast %11 : vector<16x128xf32> to vector<2x8x128xf32>
    %cst_7 = arith.constant dense<0.000000e+00> : vector<8x128xf32>
    %13 = vector.multi_reduction <add>, %12, %cst_7 [0] : vector<2x8x128xf32> to vector<8x128xf32>
    %14 = arith.extui %1 : vector<16x128xi1> to vector<16x128xi32>
    %15 = arith.sitofp %14 : vector<16x128xi32> to vector<16x128xf32>
    %16 = vector.shape_cast %15 : vector<16x128xf32> to vector<2x8x128xf32>
    %cst_8 = arith.constant dense<0.000000e+00> : vector<8x128xf32>
    %17 = vector.multi_reduction <add>, %16, %cst_8 [0] : vector<2x8x128xf32> to vector<8x128xf32>
    %c0_9 = arith.constant 0 : index
    %c0_10 = arith.constant 0 : index
    %c0_11 = arith.constant 0 : index
    %c0_12 = arith.constant 0 : index
    %18 = vector.load %arg5[%c0_9, %c0_10, %c0_11, %c0_12] : memref<1x3x8x128xf32, #tpu.memory_space<vmem>>, vector<1x1x8x128xf32>
    %19 = vector.shape_cast %18 : vector<1x1x8x128xf32> to vector<8x128xf32>
    %20 = vector.shape_cast %10 : vector<8x128xf32> to vector<1x1x8x128xf32>
    tpu.vector_store %arg5[%c0_9, %c0_10, %c0_11, %c0_12], %20 {strides = array<i32>} : memref<1x3x8x128xf32, #tpu.memory_space<vmem>>, vector<1x1x8x128xf32>,
    %c0_13 = arith.constant 0 : index
    %c1 = arith.constant 1 : index
    %c0_14 = arith.constant 0 : index
    %c0_15 = arith.constant 0 : index
    %21 = vector.load %arg5[%c0_13, %c1, %c0_14, %c0_15] : memref<1x3x8x128xf32, #tpu.memory_space<vmem>>, vector<1x1x8x128xf32>
    %22 = vector.shape_cast %21 : vector<1x1x8x128xf32> to vector<8x128xf32>
    %23 = vector.shape_cast %13 : vector<8x128xf32> to vector<1x1x8x128xf32>
    tpu.vector_store %arg5[%c0_13, %c1, %c0_14, %c0_15], %23 {strides = array<i32>} : memref<1x3x8x128xf32, #tpu.memory_space<vmem>>, vector<1x1x8x128xf32>,
    %c0_16 = arith.constant 0 : index
    %c2 = arith.constant 2 : index
    %c0_17 = arith.constant 0 : index
    %c0_18 = arith.constant 0 : index
    %24 = vector.load %arg5[%c0_16, %c2, %c0_17, %c0_18] : memref<1x3x8x128xf32, #tpu.memory_space<vmem>>, vector<1x1x8x128xf32>
    %25 = vector.shape_cast %24 : vector<1x1x8x128xf32> to vector<8x128xf32>
    %26 = vector.shape_cast %17 : vector<8x128xf32> to vector<1x1x8x128xf32>
    tpu.vector_store %arg5[%c0_16, %c2, %c0_17, %c0_18], %26 {strides = array<i32>} : memref<1x3x8x128xf32, #tpu.memory_space<vmem>>, vector<1x1x8x128xf32>,
    return
  }
  func.func @transform_0(%arg0: i32, %arg1: i32) -> (i32, i32) {
    %c1_i32 = arith.constant 1 : i32
    %0 = arith.muli %arg0, %c1_i32 : i32
    %1 = arith.addi %0, %arg1 : i32
    %c0_i32 = arith.constant 0 : i32
    %c0_i32_0 = arith.constant 0 : i32
    return %1, %c0_i32 : i32, i32
  }
  func.func @transform_1(%arg0: i32, %arg1: i32) -> (i32, i32) {
    %c1_i32 = arith.constant 1 : i32
    %0 = arith.muli %arg0, %c1_i32 : i32
    %1 = arith.addi %0, %arg1 : i32
    %c0_i32 = arith.constant 0 : i32
    %c0_i32_0 = arith.constant 0 : i32
    return %1, %c0_i32 : i32, i32
  }
  func.func @transform_2(%arg0: i32, %arg1: i32) -> (i32, i32) {
    %c1_i32 = arith.constant 1 : i32
    %0 = arith.muli %arg0, %c1_i32 : i32
    %1 = arith.addi %0, %arg1 : i32
    %c0_i32 = arith.constant 0 : i32
    %c0_i32_0 = arith.constant 0 : i32
    return %1, %c0_i32 : i32, i32
  }
  func.func @transform_3(%arg0: i32, %arg1: i32) -> (i32, i32, i32, i32) {
    %c0_i32 = arith.constant 0 : i32
    %c0_i32_0 = arith.constant 0 : i32
    %c0_i32_1 = arith.constant 0 : i32
    %c0_i32_2 = arith.constant 0 : i32
    return %arg0, %c0_i32, %c0_i32_0, %c0_i32_1 : i32, i32, i32, i32
  }
}

</mosaic_0001>

<bundles_post_ra>
// kernel: tpu_custom_call.1
= control target key start
LH: loop header
LB: loop body
LE: loop exit
PB: predicated region body
PF: predicated region fallthrough
CT: control target
= control target key end

     0   :  { %8 = vsyncpa [#allocation3], 0  ;;  %s276_s0 = inlined_call_operand.vmem [shape: f32[16,128], index: 0, kind: input, shape index: {}]   ;;  %s277_s1 = inlined_call_operand.hbm [shape: f32[16,128], index: 1, kind: input, shape index: {}]   ;;  %s278_s2 = inlined_call_operand.vmem [shape: s32[16,128], index: 2, kind: input, shape index: {}]   ;;  %s279_s3 = inlined_call_operand.hbm [shape: f32[1,3,8,128], index: 3, kind: output, shape index: {}]  }
   0x1   :  { %9 = vsyncpa [#allocation4], 0  ;;  %s205_s12 = smov [#allocation2]   ;;  %s157_s16 = scalar_lea.hbm %s277_s1, 256 }
   0x2   :  { %s29_s13 = sshll.u32 %s205_s12, 4  ;;  %p158_p0 = scmp.ne.s32.totalorder %s277_s1, %s157_s16  ;;  %s30_s13 = int_to_ptr.vmem [resolvable:$true] %s29_s13 }
   0x3   :  { %p161_p1 = scmp.lt.u32.totalorder %s157_s16, %s277_s1 }
   0x5   :  { %p163_p2 = pnand %p161_p1, %p158_p0 }
   0x7   :  { %166 = shalt.err (!%p163_p2)
}
   0x8   :  { %s167_s21 = scalar_lea.vmem %s30_s13, 256  ;;  %p172_p4 = scmp.lt.s32.totalorder %s30_s13, %s30_s13 }
   0x9   :  { %p168_p3 = scmp.ne.s32.totalorder %s30_s13, %s167_s21  ;;  %p173_p5 = scmp.lt.s32.totalorder %s167_s21, %s167_s21 }
   0xb   :  { %p174_p6 = por %p173_p5, %p172_p4 }
   0xd   :  { %p175_p7 = pnand %p174_p6, %p168_p3 }
   0xf   :  { %178 = shalt.err (!%p175_p7)
}
  0x10   :  { %s206_s22 = smov 128   ;;  %s207_s23 = smov 8  }
  0x11   :  { %35 = dma.hbm_to_vmem [thread:$0]  %s277_s1, 256, %s30_s13, [#allocation3], %s206_s22, %s206_s22, %s207_s23  }
  0x12   :  { %201 = dma.done.wait [#allocation3], 256  }
  0x13   :  { %202 = vsyncadd [#allocation3], 4294967040  ;;  %v79_v0 = vld [vmem:[%s278_s2] sm:$0xff]  ;;  %v80_v1 = vld [vmem:[%s278_s2 + $0x8] sm:$0xff]  ;;  %v208_v6 = vmov 0.0  }
  0x14   :  { %v83_v2 = vld [vmem:[%s276_s0] sm:$0xff]  ;;  %vm81_vm0 = vcmp.ne.s32.totalorder %v79_v0, 0  ;;  %vm82_vm1 = vcmp.ne.s32.totalorder %v80_v1, 0  ;;  %v84_v3 = vld [vmem:[%s276_s0 + $0x8] sm:$0xff]  ;;  %s209_s0 = smov [#allocation5]  }
  0x15   :  { %149 = vlog2.f32 %v83_v2  ;;  %v89_v4 = vld [vmem:[#allocation2] sm:$0xff]  ;;  %v90_v5 = vld [vmem:[#allocation2 + $0x8] sm:$0xff]  ;;  %v142_v7 = vsel %vm81_vm0, 1.0, %v208_v6  ;;  %v143_v8 = vsel %vm82_vm1, 1.0, %v208_v6  ;;  %s118_s1 = sshll.u32 %s209_s0, 4  ;;  %s119_s1 = int_to_ptr.vmem [resolvable:$true] %s118_s1 }
  0x16   :  { %151 = vlog2.f32 %v84_v3  ;;  %v107_v9 = vadd.f32 %v143_v8, %v142_v7  ;;  %s179_s2 = scalar_lea.vmem %s119_s1, 384  ;;  %p184_p9 = scmp.lt.s32.totalorder %s119_s1, %s119_s1 }
  0x17   :  { %153 = vlog2.f32 %v89_v4  ;;  %p180_p8 = scmp.ne.s32.totalorder %s119_s1, %s179_s2  ;;  %p185_p10 = scmp.lt.s32.totalorder %s179_s2, %s179_s2 }
  0x18   :  { %155 = vlog2.f32 %v90_v5  ;;  %112 = vst [vmem:[#allocation5 + $0x10] sm:$0xff] %v107_v9 }
  0x19   :  { %p186_p11 = por %p185_p10, %p184_p9 }
  0x1b   :  { %p187_p12 = pnand %p186_p11, %p180_p8 }
  0x1f   :  { %v150_v10 = vpop.eup %149 }
  0x20   :  { %v152_v11 = vpop.eup %151  ;;  %v86_v12 = vmul.f32 0.6931472, %v150_v10 }
  0x21   :  { %v154_v13 = vpop.eup %153  ;;  %v88_v14 = vmul.f32 0.6931472, %v152_v11 }
  0x22   :  { %v156_v15 = vpop.eup %155  ;;  %v92_v16 = vmul.f32 0.6931472, %v154_v13 }
  0x23   :  { %v94_v17 = vmul.f32 0.6931472, %v156_v15 }
  0x24   :  { %v95_v18 = vsub.f32 %v86_v12, %v92_v16 }
  0x25   :  { %v96_v19 = vsub.f32 %v88_v14, %v94_v17 }
  0x26   :  { %v97_v20 = vsel %vm81_vm0, %v95_v18, 0.0 }
  0x27   :  { %v98_v21 = vsel %vm82_vm1, %v96_v19, 0.0  ;;  %v100_v22 = vmul.f32 %v97_v20, %v97_v20 }
  0x28   :  { %v99_v23 = vadd.f32 %v98_v21, %v97_v20  ;;  %v101_v24 = vmul.f32 %v98_v21, %v98_v21 }
  0x2a   :  { %108 = vst [vmem:[#allocation5] sm:$0xff] %v99_v23  ;;  %v102_v25 = vadd.f32 %v101_v24, %v100_v22 }
  0x2c   :  { %110 = vst [vmem:[#allocation5 + $0x8] sm:$0xff] %v102_v25 }
  0x2d   :  { %190 = shalt.err (!%p187_p12)
}
  0x2e   :  { %s191_s9 = scalar_lea.hbm %s279_s3, 384 }
  0x2f   :  { %p192_p13 = scmp.ne.s32.totalorder %s279_s3, %s191_s9  ;;  %p195_p0 = scmp.lt.u32.totalorder %s191_s9, %s279_s3 }
  0x31   :  { %p197_p1 = pnand %p195_p0, %p192_p13 }
  0x33   :  { %200 = shalt.err (!%p197_p1)
}
  0x34   :  { %124 = dma.vmem_to_hbm [thread:$0]  %s119_s1, 384, %s279_s3, [#allocation4], %s206_s22, %s206_s22, %s207_s23  }
  0x35   :  { %203 = dma.done.wait [#allocation4], 384  }
  0x36   :  { %204 = vsyncadd [#allocation4], 4294966912 }
  0x37   :  { %128 = vsyncpa [#allocation3], 1 }
  0x38   :  { %129 = vsyncpa [#allocation4], 1 }

</bundles_post_ra>
